<compile_context>
chip_gen: v5e
topology: v5e:2x2
jax: 0.10.0
libtpu: 0.0.40
codegen_flags: <defaults>
</compile_context>

<pallas_src>
import jax
import jax.numpy as jnp
from jax.experimental import pallas as pl
from jax.experimental.pallas import tpu as pltpu

_LANES = 128


def _cdiv(a, b):
    return -(-a // b)


def _v_mse_kernel(pred_ref, label_ref, mask_ref, loss_ref, msum_ref):
    # pred_ref/label_ref: (TB, C,  TR, 128) VMEM block, native dtype
    # mask_ref:           (TB, CM, TR, 128) VMEM block, native dtype
    # loss_ref/msum_ref:  (TB, 8, 128) f32 output blocks, resident across the
    #                     spatial ("arbitrary") grid axis -> accumulators.
    s = pl.program_id(1)

    @pl.when(s == 0)
    def _():
        loss_ref[...] = jnp.zeros_like(loss_ref)
        msum_ref[...] = jnp.zeros_like(msum_ref)

    tb, _, tr, lanes = pred_ref.shape   # tr is a multiple of 8 by construction

    # Channel max in the native dtype (max commutes with the upcast), then f32.
    pv = jnp.max(pred_ref[...], axis=1).astype(jnp.float32)    # (TB, TR, 128)
    lv = jnp.max(label_ref[...], axis=1).astype(jnp.float32)   # (TB, TR, 128)
    d = pv - lv
    # Fold TR onto (TR//8, 8) and sum the leading factor: pure vreg-wise VALU
    # adds into the (TB, 8, 128) resident accumulator (no XLU, no partial vst).
    sq = (d * d).reshape(tb, tr // 8, 8, lanes)
    loss_ref[...] += jnp.sum(sq, axis=1)

    m = jnp.sum(mask_ref[...].astype(jnp.float32), axis=1)     # (TB, TR, 128)
    msum_ref[...] += jnp.sum(m.reshape(tb, tr // 8, 8, lanes), axis=1)


def _choose_tiles(n, r8, per_row_bytes, budget_bytes):
    """Pick (tb, tr, gs): batch tile, spatial-row tile, spatial grid extent.

    `per_row_bytes` is the double-buffered block bytes per (sample, 128-lane
    row); `budget_bytes` bounds tb * tr * per_row_bytes.
    """
    max_rows = max(16, budget_bytes // per_row_bytes)   # (sample x row) slots/step

    # Batch tile: a divisor of n (no batch padding).  Keep gb = n // tb >= 2
    # whenever n >= 2 so both v7x TensorCores get a "parallel" slice, and
    # respect the per-step row budget.
    cap = max(1, max_rows // min(r8, 16))
    tb = 1
    for d in range(1, n + 1):
        if d > cap:
            break
        if n % d:
            continue
        if n >= 2 and d == n:
            continue                      # would leave gb == 1 (one core idle)
        tb = d

    rows_per_sample = max_rows // tb
    if r8 <= rows_per_sample:
        tr, gs = r8, 1                    # whole (padded) spatial extent per step
    else:
        rows_cap = max(16, (rows_per_sample // 16) * 16)
        gs = _cdiv(r8, rows_cap)
        tr = _cdiv(_cdiv(r8, gs), 16) * 16   # balanced split, minimal rounding waste
    return tb, tr, gs


def v_mse_loss(pred, label, mask, min_area=1000.0,
               block_budget_bytes=24 * 1024 * 1024):
    """Pallas TPU implementation of V_MSE_Loss.forward.

    pred:  (N, C, H, W)  float (f32 / bf16 / ...)
    label: (N, C, H, W)  float
    mask:  (N, Cm, H, W) float (narrow dtypes like bf16 reduce HBM traffic)
    returns: (N,) float32 per-sample loss
    """
    n, c, h, w = pred.shape
    cm = mask.shape[1]
    hw = h * w

    # 128-lane rows, rounded up to 8 sublanes so per-step accumulation stays
    # vreg-aligned.  Zero padding is exact (max(0,0) diff = 0, mask adds 0).
    r8 = _cdiv(_cdiv(hw, _LANES), 8) * 8

    per_row = (c * (jnp.dtype(pred.dtype).itemsize
                    + jnp.dtype(label.dtype).itemsize)
               + cm * jnp.dtype(mask.dtype).itemsize) * _LANES * 2  # x2 dbl-buf
    tb, tr, gs = _choose_tiles(n, r8, per_row, int(block_budget_bytes))
    rp = tr * gs
    gb = n // tb

    def _prep(x, cdim):
        x = x.reshape(n, cdim, hw)
        pad = rp * _LANES - hw
        if pad:
            x = jnp.pad(x, ((0, 0), (0, 0), (0, pad)))
        return x.reshape(n, cdim, rp, _LANES)

    pred_p = _prep(pred, c)
    label_p = _prep(label, c)
    mask_p = _prep(mask, cm)

    vmem_limit = min(int(block_budget_bytes) + 16 * 1024 * 1024,
                     56 * 1024 * 1024)   # <= 56 MiB keeps v7x (64 MiB) happy

    loss_part, mask_part = pl.pallas_call(
        _v_mse_kernel,
        out_shape=(jax.ShapeDtypeStruct((n, 8, _LANES), jnp.float32),
                   jax.ShapeDtypeStruct((n, 8, _LANES), jnp.float32)),
        grid=(gb, gs),
        in_specs=[
            pl.BlockSpec((tb, c, tr, _LANES), lambda b, s: (b, 0, s, 0)),
            pl.BlockSpec((tb, c, tr, _LANES), lambda b, s: (b, 0, s, 0)),
            pl.BlockSpec((tb, cm, tr, _LANES), lambda b, s: (b, 0, s, 0)),
        ],
        out_specs=(
            pl.BlockSpec((tb, 8, _LANES), lambda b, s: (b, 0, 0)),
            pl.BlockSpec((tb, 8, _LANES), lambda b, s: (b, 0, 0)),
        ),
        compiler_params=pltpu.CompilerParams(
            dimension_semantics=("parallel", "arbitrary"),
            vmem_limit_bytes=vmem_limit,
            allow_input_fusion=[True, True, True],
        ),
    )(pred_p, label_p, mask_p)

    # Tiny final reduction (8 KiB/sample) + clamp done in plain XLA.
    loss_tot = jnp.sum(loss_part, axis=(1, 2))
    mask_tot = jnp.sum(mask_part, axis=(1, 2))
    return loss_tot / jnp.maximum(mask_tot, jnp.float32(min_area))


def v_mse_loss_ref(pred, label, mask, min_area=1000.0):
    """Plain-JAX reference mirroring the PyTorch module."""
    pv = jnp.max(pred.astype(jnp.float32), axis=1)
    lv = jnp.max(label.astype(jnp.float32), axis=1)
    loss = jnp.sum((pv - lv) ** 2, axis=(1, 2))
    mask_sum = jnp.sum(mask.astype(jnp.float32), axis=(1, 2, 3))
    delim = jnp.maximum(mask_sum, min_area)   # pred.size(1) == 1 after unsqueeze
    return loss / delim


if __name__ == "__main__":
    key = jax.random.PRNGKey(0)
    k1, k2, k3, k4, k5 = jax.random.split(key, 5)

    run = jax.jit(v_mse_loss,
                  static_argnames=("min_area", "block_budget_bytes"))

    def make_case(k, n, c, h, w, dtype=jnp.float32, mask_dtype=jnp.float32):
        a, b, m = jax.random.split(k, 3)
        pred = jax.random.uniform(a, (n, c, h, w)).astype(dtype)
        label = jax.random.uniform(b, (n, c, h, w)).astype(dtype)
        mask = (jax.random.uniform(m, (n, 1, h, w)) > 0.5).astype(mask_dtype)
        return pred, label, mask

    # Case 1: H*W divisible by 128 (lane-dense reshape).  N=2 -> gb=2.
    pred, label, mask = make_case(k1, 2, 3, 16, 16)
    out = jax.block_until_ready(run(pred, label, mask, min_area=1000.0))
    ref = v_mse_loss_ref(pred, label, mask, min_area=1000.0)
    assert out.shape == (2,)
    assert jnp.allclose(out, ref, atol=1e-5, rtol=1e-5), (out, ref)

    # Case 2: H*W not divisible by 128 (exercises the small zero-pad path), N=3.
    pred, label, mask = make_case(k2, 3, 3, 10, 10)
    out = jax.block_until_ready(run(pred, label, mask, min_area=50.0))
    ref = v_mse_loss_ref(pred, label, mask, min_area=50.0)
    assert jnp.allclose(out, ref, atol=1e-5, rtol=1e-5), (out, ref)

    # Case 3: tiny block budget forces the multi-step spatial ("arbitrary")
    # reduction axis with the resident-output accumulation.
    pred, label, mask = make_case(k3, 2, 3, 64, 64)
    out = jax.block_until_ready(
        run(pred, label, mask, min_area=1000.0,
            block_budget_bytes=16 * 1024))
    ref = v_mse_loss_ref(pred, label, mask, min_area=1000.0)
    assert jnp.allclose(out, ref, atol=1e-4, rtol=1e-5), (out, ref)

    # Case 4: bf16 pred/label stay bf16 through the DMA (f32 accumulation).
    pred, label, mask = make_case(k4, 2, 3, 16, 16, dtype=jnp.bfloat16)
    out = jax.block_until_ready(run(pred, label, mask, min_area=1000.0))
    ref = v_mse_loss_ref(pred, label, mask, min_area=1000.0)
    assert jnp.allclose(out, ref, atol=1e-5, rtol=1e-5), (out, ref)

    # Case 5: narrow (bf16) mask + N=4 -> tb=2, gb=2 (no batch padding).
    pred, label, mask = make_case(k5, 4, 3, 32, 32, mask_dtype=jnp.bfloat16)
    out = jax.block_until_ready(run(pred, label, mask, min_area=200.0))
    ref = v_mse_loss_ref(pred, label, mask, min_area=200.0)
    assert jnp.allclose(out, ref, atol=1e-5, rtol=1e-5), (out, ref)

    print("KERNEL_OK")
</pallas_src>

<mosaic_0001>
module attributes {stable_mosaic.version = 11 : i64} {
  func.func @_v_mse_kernel(%arg0: i32, %arg1: i32, %arg2: memref<1x3x8x128xf32, #tpu.memory_space<vmem>>, %arg3: memref<1x3x8x128xf32, #tpu.memory_space<vmem>>, %arg4: memref<1x1x8x128xf32, #tpu.memory_space<vmem>>, %arg5: memref<1x8x128xf32, #tpu.memory_space<vmem>>, %arg6: memref<1x8x128xf32, #tpu.memory_space<vmem>>) attributes {dimension_semantics = [#tpu.dimension_semantics<parallel>, #tpu.dimension_semantics<arbitrary>], iteration_bounds = array<i64: 2, 1>, scalar_prefetch = 0 : i64, scratch_operands = 0 : i64, tpu.core_type = #tpu.core_type<tc>, window_params = [{transform_indices = @transform_0, window_bounds = array<i64: 1, 3, 8, 128>}, {transform_indices = @transform_1, window_bounds = array<i64: 1, 3, 8, 128>}, {transform_indices = @transform_2, window_bounds = array<i64: 1, 1, 8, 128>}, {transform_indices = @transform_3, window_bounds = array<i64: 1, 8, 128>}, {transform_indices = @transform_4, window_bounds = array<i64: 1, 8, 128>}]} {
    %c0_i32 = arith.constant 0 : i32
    %0 = arith.cmpi eq, %arg1, %c0_i32 : i32
    %1 = arith.extui %0 : i1 to i32
    %c0_i32_0 = arith.constant 0 : i32
    %2 = arith.cmpi ne, %1, %c0_i32_0 : i32
    scf.if %2 {
      %cst_28 = arith.constant 0.000000e+00 : f32
      %21 = vector.broadcast %cst_28 : f32 to vector<1x8x128xf32>
      %c0_29 = arith.constant 0 : index
      %c0_30 = arith.constant 0 : index
      %c0_31 = arith.constant 0 : index
      %22 = vector.load %arg5[%c0_29, %c0_30, %c0_31] : memref<1x8x128xf32, #tpu.memory_space<vmem>>, vector<1x8x128xf32>
      tpu.vector_store %arg5[%c0_29, %c0_30, %c0_31], %21 {strides = array<i32>} : memref<1x8x128xf32, #tpu.memory_space<vmem>>, vector<1x8x128xf32>,
      %cst_32 = arith.constant 0.000000e+00 : f32
      %23 = vector.broadcast %cst_32 : f32 to vector<1x8x128xf32>
      %c0_33 = arith.constant 0 : index
      %c0_34 = arith.constant 0 : index
      %c0_35 = arith.constant 0 : index
      %24 = vector.load %arg6[%c0_33, %c0_34, %c0_35] : memref<1x8x128xf32, #tpu.memory_space<vmem>>, vector<1x8x128xf32>
      tpu.vector_store %arg6[%c0_33, %c0_34, %c0_35], %23 {strides = array<i32>} : memref<1x8x128xf32, #tpu.memory_space<vmem>>, vector<1x8x128xf32>,
    } else {
    }
    %c0 = arith.constant 0 : index
    %c0_1 = arith.constant 0 : index
    %c0_2 = arith.constant 0 : index
    %c0_3 = arith.constant 0 : index
    %3 = vector.load %arg2[%c0, %c0_1, %c0_2, %c0_3] : memref<1x3x8x128xf32, #tpu.memory_space<vmem>>, vector<1x3x8x128xf32>
    %cst = arith.constant dense<0xFF800000> : vector<1x8x128xf32>
    %4 = vector.multi_reduction <maximumf>, %3, %cst [1] : vector<1x3x8x128xf32> to vector<1x8x128xf32>
    %c0_4 = arith.constant 0 : index
    %c0_5 = arith.constant 0 : index
    %c0_6 = arith.constant 0 : index
    %c0_7 = arith.constant 0 : index
    %5 = vector.load %arg3[%c0_4, %c0_5, %c0_6, %c0_7] : memref<1x3x8x128xf32, #tpu.memory_space<vmem>>, vector<1x3x8x128xf32>
    %cst_8 = arith.constant dense<0xFF800000> : vector<1x8x128xf32>
    %6 = vector.multi_reduction <maximumf>, %5, %cst_8 [1] : vector<1x3x8x128xf32> to vector<1x8x128xf32>
    %7 = arith.subf %4, %6 : vector<1x8x128xf32>
    %8 = arith.mulf %7, %7 : vector<1x8x128xf32>
    %9 = vector.shape_cast %8 : vector<1x8x128xf32> to vector<1x1x8x128xf32>
    %c0_9 = arith.constant 0 : index
    %c0_10 = arith.constant 0 : index
    %c0_11 = arith.constant 0 : index
    %10 = vector.load %arg5[%c0_9, %c0_10, %c0_11] : memref<1x8x128xf32, #tpu.memory_space<vmem>>, vector<1x8x128xf32>
    %cst_12 = arith.constant dense<0.000000e+00> : vector<1x8x128xf32>
    %11 = vector.multi_reduction <add>, %9, %cst_12 [1] : vector<1x1x8x128xf32> to vector<1x8x128xf32>
    %12 = arith.addf %10, %11 : vector<1x8x128xf32>
    %c0_13 = arith.constant 0 : index
    %c0_14 = arith.constant 0 : index
    %c0_15 = arith.constant 0 : index
    %13 = vector.load %arg5[%c0_13, %c0_14, %c0_15] : memref<1x8x128xf32, #tpu.memory_space<vmem>>, vector<1x8x128xf32>
    tpu.vector_store %arg5[%c0_13, %c0_14, %c0_15], %12 {strides = array<i32>} : memref<1x8x128xf32, #tpu.memory_space<vmem>>, vector<1x8x128xf32>,
    %c0_16 = arith.constant 0 : index
    %c0_17 = arith.constant 0 : index
    %c0_18 = arith.constant 0 : index
    %c0_19 = arith.constant 0 : index
    %14 = vector.load %arg4[%c0_16, %c0_17, %c0_18, %c0_19] : memref<1x1x8x128xf32, #tpu.memory_space<vmem>>, vector<1x1x8x128xf32>
    %cst_20 = arith.constant dense<0.000000e+00> : vector<1x8x128xf32>
    %15 = vector.multi_reduction <add>, %14, %cst_20 [1] : vector<1x1x8x128xf32> to vector<1x8x128xf32>
    %c0_21 = arith.constant 0 : index
    %c0_22 = arith.constant 0 : index
    %c0_23 = arith.constant 0 : index
    %16 = vector.load %arg6[%c0_21, %c0_22, %c0_23] : memref<1x8x128xf32, #tpu.memory_space<vmem>>, vector<1x8x128xf32>
    %17 = vector.shape_cast %15 : vector<1x8x128xf32> to vector<1x1x8x128xf32>
    %cst_24 = arith.constant dense<0.000000e+00> : vector<1x8x128xf32>
    %18 = vector.multi_reduction <add>, %17, %cst_24 [1] : vector<1x1x8x128xf32> to vector<1x8x128xf32>
    %19 = arith.addf %16, %18 : vector<1x8x128xf32>
    %c0_25 = arith.constant 0 : index
    %c0_26 = arith.constant 0 : index
    %c0_27 = arith.constant 0 : index
    %20 = vector.load %arg6[%c0_25, %c0_26, %c0_27] : memref<1x8x128xf32, #tpu.memory_space<vmem>>, vector<1x8x128xf32>
    tpu.vector_store %arg6[%c0_25, %c0_26, %c0_27], %19 {strides = array<i32>} : memref<1x8x128xf32, #tpu.memory_space<vmem>>, vector<1x8x128xf32>,
    return
  }
  func.func @transform_0(%arg0: i32, %arg1: i32) -> (i32, i32, i32, i32) {
    %c0_i32 = arith.constant 0 : i32
    %c0_i32_0 = arith.constant 0 : i32
    %c0_i32_1 = arith.constant 0 : i32
    return %arg0, %c0_i32, %arg1, %c0_i32_0 : i32, i32, i32, i32
  }
  func.func @transform_1(%arg0: i32, %arg1: i32) -> (i32, i32, i32, i32) {
    %c0_i32 = arith.constant 0 : i32
    %c0_i32_0 = arith.constant 0 : i32
    %c0_i32_1 = arith.constant 0 : i32
    return %arg0, %c0_i32, %arg1, %c0_i32_0 : i32, i32, i32, i32
  }
  func.func @transform_2(%arg0: i32, %arg1: i32) -> (i32, i32, i32, i32) {
    %c0_i32 = arith.constant 0 : i32
    %c0_i32_0 = arith.constant 0 : i32
    %c0_i32_1 = arith.constant 0 : i32
    return %arg0, %c0_i32, %arg1, %c0_i32_0 : i32, i32, i32, i32
  }
  func.func @transform_3(%arg0: i32, %arg1: i32) -> (i32, i32, i32) {
    %c0_i32 = arith.constant 0 : i32
    %c0_i32_0 = arith.constant 0 : i32
    %c0_i32_1 = arith.constant 0 : i32
    return %arg0, %c0_i32, %c0_i32_0 : i32, i32, i32
  }
  func.func @transform_4(%arg0: i32, %arg1: i32) -> (i32, i32, i32) {
    %c0_i32 = arith.constant 0 : i32
    %c0_i32_0 = arith.constant 0 : i32
    %c0_i32_1 = arith.constant 0 : i32
    return %arg0, %c0_i32, %c0_i32_0 : i32, i32, i32
  }
}

</mosaic_0001>

<bundles_post_ra>
// kernel: v_mse_loss.1
= control target key start
LH: loop header
LB: loop body
LE: loop exit
PB: predicated region body
PF: predicated region fallthrough
CT: control target
= control target key end

     0   :  { %s535_s15 = smov 0   ;;  %s537_s16 = smov 0   ;;  %s577_s0 = inlined_call_operand.vmem [shape: f32[2,3,8,128], index: 0, kind: input, shape index: {}]   ;;  %s578_s1 = inlined_call_operand.vmem [shape: f32[2,3,8,128], index: 1, kind: input, shape index: {}]   ;;  %s579_s2 = inlined_call_operand.vmem [shape: f32[2,1,8,128], index: 2, kind: input, shape index: {}]   ;;  %s580_s3 = inlined_call_operand.vmem [shape: f32[2,8,128], index: 3, kind: output, shape index: {0}]   ;;  %s581_s4 = inlined_call_operand.vmem [shape: f32[2,8,128], index: 4, kind: output, shape index: {1}]  }
   0x1   :  { %s539_s17 = smov 0  }
   0x2 LB: > { %s27_s18 = sadd.s32 1, %s504_s16  ;;  %p452_p0 = scmp.ge.s32.totalorder %s508_s17, 1  ;;  %s508_s17 = sphi %s539_s17, %s15_s17   ;;  %s504_s16 = sphi %s537_s16, %s583_s16   ;;  %s500_s15 = sphi %s535_s15, %s582_s15  }
   0x3   : > { %p29_p1 = scmp.ge.s32.totalorder %s27_s18, 2  ;;  %p211_p2 = scmp.lt.s32.totalorder %s508_s17, 3 }
   0x5   : > { %s585_s18 = smov (%p29_p1, %s27_s18), 0  ;;  %p212_p3 = pnand %p452_p0, %p211_p2 }
   0x6   : > { %p258_p4 = scmp.lt.s32.totalorder (!%p212_p3), %s500_s15, 1 }
   0x7   : > { %215 = sbr.rel (%p212_p3) target bundleno = 27 (0x1b), region = 32 }
   0xc   : > { %s587_s15 = smov (!%p258_p4, %s500_s15), 1 }
   0xd   : > { %s460_s19 = smul.u32 24, %s587_s15  ;;  %s455_s20 = sshll.u32 %s587_s15, 3 }
   0xe   : > { %s280_s29 = scalar_lea.vmem %s579_s2, %s455_s20  ;;  %s288_s6 = scalar_lea.vmem %s581_s4, %s455_s20 }
   0xf   : > { %s265_s23 = scalar_lea.vmem %s577_s0, %s460_s19  ;;  %s273_s26 = scalar_lea.vmem %s578_s1, %s460_s19  ;;  %v311_v8 = vld [vmem:[%s280_s29] sm:$0xff] }
  0x10   : > { %v295_v0 = vld [vmem:[%s265_s23] sm:$0xff]  ;;  %v296_v1 = vld [vmem:[%s265_s23 + $0x8] sm:$0xff]  ;;  %v297_v2 = vld [vmem:[%s265_s23 + $0x10] sm:$0xff]  ;;  %316 = vst [vmem:[%s288_s6] sm:$0xff] %v311_v8  ;;  %s284_s9 = scalar_lea.vmem %s580_s3, %s455_s20 }
  0x11   : > { %v298_v3 = vmax.f32 %v295_v0, %v296_v1  ;;  %v300_v4 = vld [vmem:[%s273_s26] sm:$0xff]  ;;  %v301_v5 = vld [vmem:[%s273_s26 + $0x8] sm:$0xff]  ;;  %v302_v6 = vld [vmem:[%s273_s26 + $0x10] sm:$0xff] }
  0x12   : > { %v303_v7 = vmax.f32 %v300_v4, %v301_v5 }
  0x13   : > { %v299_v9 = vmax.f32 %v298_v3, %v297_v2 }
  0x14   : > { %v304_v10 = vmax.f32 %v303_v7, %v302_v6 }
  0x16   : > { %v305_v11 = vsub.f32 %v299_v9, %v304_v10 }
  0x18   : > { %v306_v12 = vmul.f32 %v305_v11, %v305_v11 }
  0x1a   : > { %310 = vst [vmem:[%s284_s9] sm:$0xff] %v306_v12 }
  0x1b PF: > { %s15_s17 = sadd.s32 1, %s508_s17   ;;  %s582_s15 = smov %s504_s16 }
  0x1c   : > { %p12_p5 = scmp.ge.s32.totalorder %s15_s17, 4   ;;  %s583_s16 = smov %s585_s18 }
  0x1e   :  { %14 = sbr.rel (!%p12_p5) target bundleno = 2 (0x2), region = 84 }

</bundles_post_ra>
